<compile_context>
chip_gen: v6e
topology: v6e:2x2x1
jax: 0.10.0
libtpu: 0.0.40
codegen_flags: <defaults>
</compile_context>

<pallas_src>
import jax
import jax.numpy as jnp
from jax.experimental import pallas as pl
from jax.experimental.pallas import tpu as pltpu


def _round_up(x: int, m: int) -> int:
    return ((x + m - 1) // m) * m


def _linear_kernel(x_ref, w_ref, b_ref, o_ref):
    # MXU matmul with f32 accumulation + VPU bias add. Full precision since we
    # validate against an f32 reference.
    acc = jnp.dot(
        x_ref[...],
        w_ref[...],
        preferred_element_type=jnp.float32,
        precision=jax.lax.Precision.HIGHEST,
    )
    o_ref[...] = (acc + b_ref[...]).astype(o_ref.dtype)


def reshape_output_forward(x, weight, bias, *, tm_max: int = 512):
    """Equivalent of ReshapeOutput(model).forward(x) with model = Linear(H, C).

    x:      (B, S, H) float32
    weight: (H, C)    float32
    bias:   (C,)      float32
    returns logits of shape (B*S, C)  == model(x).reshape(-1, C)
    """
    B, S, H = x.shape
    C = weight.shape[1]
    M = B * S

    x2d = x.reshape(M, H)          # flatten: equivalent since Linear is over last dim
    b2d = bias.reshape(1, C)

    # Tile the M axis. TM is capped (VMEM-friendly on all generations incl.
    # v7x's 64 MiB) and a multiple of 8 (sublane constraint). Pad M so the
    # grid divides evenly; the pad rows are sliced off afterwards.
    # NOTE: at tiny M (like the demo shapes) launch/DMA overhead dominates and
    # a plain jnp.einsum would be cheaper; the Pallas path pays off once
    # M = B*S reaches thousands of rows.
    TM = min(tm_max, _round_up(M, 8))
    M_pad = _round_up(M, TM)
    if M_pad != M:
        x2d = jnp.pad(x2d, ((0, M_pad - M), (0, 0)))

    grid = (M_pad // TM,)

    out = pl.pallas_call(
        _linear_kernel,
        out_shape=jax.ShapeDtypeStruct((M_pad, C), x.dtype),
        grid=grid,
        in_specs=[
            pl.BlockSpec((TM, H), lambda i: (i, 0)),   # x tile marches over M
            pl.BlockSpec((H, C), lambda i: (0, 0)),    # weight resident
            pl.BlockSpec((1, C), lambda i: (0, 0)),    # bias resident
        ],
        out_specs=pl.BlockSpec((TM, C), lambda i: (i, 0)),
        compiler_params=pltpu.CompilerParams(
            # M tiles are independent -> shard across both TCs on v7x.
            dimension_semantics=("parallel",),
            # Explicit budget valid on every generation (v7x default scoped
            # limit is 32 MiB; per-step footprint here is well under 1 MiB).
            vmem_limit_bytes=32 * 1024 * 1024,
        ),
        cost_estimate=pl.CostEstimate(
            flops=2 * M_pad * H * C,
            bytes_accessed=4 * (M_pad * H + H * C + C + M_pad * C),
            transcendentals=0,
        ),
    )(x2d, weight, b2d)

    if M_pad != M:
        out = out[:M]
    # Output is already (M, C) == logits.reshape(-1, logits.size(-1)).
    return out


if __name__ == "__main__":
    # Small shapes consistent with the forward: batch=2, seq=8, hidden=32, classes=128
    B, S, H, C = 2, 8, 32, 128

    key = jax.random.PRNGKey(0)
    kx, kw, kb = jax.random.split(key, 3)

    x = jax.random.normal(kx, (B, S, H), dtype=jnp.float32)
    # Deterministic parameter init for the synthetic wrapped model.
    weight = jax.random.normal(kw, (H, C), dtype=jnp.float32) * 0.02
    bias = jax.random.normal(kb, (C,), dtype=jnp.float32) * 0.01

    logits = reshape_output_forward(x, weight, bias)
    logits = jax.block_until_ready(logits)

    # Reference check in plain JAX (model(x).reshape(-1, C)), full f32 precision.
    ref = (
        jnp.einsum("bsh,hc->bsc", x, weight, precision=jax.lax.Precision.HIGHEST)
        + bias
    ).reshape(-1, C)
    assert logits.shape == (B * S, C), logits.shape
    assert jnp.allclose(logits, ref, atol=1e-5, rtol=1e-5)

    print("KERNEL_OK")
</pallas_src>

<mosaic_0001>
module attributes {stable_mosaic.version = 11 : i64} {
  func.func @_linear_kernel(%arg0: i32, %arg1: memref<16x32xf32, #tpu.memory_space<vmem>>, %arg2: memref<32x128xf32, #tpu.memory_space<vmem>>, %arg3: memref<1x128xf32, #tpu.memory_space<vmem>>, %arg4: memref<16x128xf32, #tpu.memory_space<vmem>>) attributes {dimension_semantics = [#tpu.dimension_semantics<parallel>], iteration_bounds = array<i64: 1>, scalar_prefetch = 0 : i64, scratch_operands = 0 : i64, tpu.core_type = #tpu.core_type<tc>, window_params = [{transform_indices = @transform_0, window_bounds = array<i64: 16, 32>}, {pipeline_mode = #tpu.pipeline_mode<synchronous>, transform_indices = @transform_1, window_bounds = array<i64: 32, 128>}, {pipeline_mode = #tpu.pipeline_mode<synchronous>, transform_indices = @transform_2, window_bounds = array<i64: 1, 128>}, {transform_indices = @transform_3, window_bounds = array<i64: 16, 128>}]} {
    %c0 = arith.constant 0 : index
    %c0_0 = arith.constant 0 : index
    %0 = vector.load %arg1[%c0, %c0_0] : memref<16x32xf32, #tpu.memory_space<vmem>>, vector<16x32xf32>
    %c0_1 = arith.constant 0 : index
    %c0_2 = arith.constant 0 : index
    %1 = vector.load %arg2[%c0_1, %c0_2] : memref<32x128xf32, #tpu.memory_space<vmem>>, vector<32x128xf32>
    %cst = arith.constant dense<0.000000e+00> : vector<16x128xf32>
    %2 = tpu.matmul %0, %1, %cst {dimension_numbers = #tpu.dot_dimension_numbers<[1], [0], [0], [1], [0, 0, 1, 1], [], []>, precision = #tpu.contract_precision<fp32>} : vector<16x32xf32>, vector<32x128xf32>, vector<16x128xf32> -> vector<16x128xf32>
    %c0_3 = arith.constant 0 : index
    %c0_4 = arith.constant 0 : index
    %3 = vector.load %arg3[%c0_3, %c0_4] : memref<1x128xf32, #tpu.memory_space<vmem>>, vector<1x128xf32>
    %4 = vector.broadcast %3 : vector<1x128xf32> to vector<16x128xf32>
    %5 = arith.addf %2, %4 : vector<16x128xf32>
    %c0_5 = arith.constant 0 : index
    %c0_6 = arith.constant 0 : index
    %6 = vector.load %arg4[%c0_5, %c0_6] : memref<16x128xf32, #tpu.memory_space<vmem>>, vector<16x128xf32>
    tpu.vector_store %arg4[%c0_5, %c0_6], %5 {strides = array<i32>} : memref<16x128xf32, #tpu.memory_space<vmem>>, vector<16x128xf32>,
    return
  }
  func.func @transform_0(%arg0: i32) -> (i32, i32) {
    %c0_i32 = arith.constant 0 : i32
    %c0_i32_0 = arith.constant 0 : i32
    return %arg0, %c0_i32 : i32, i32
  }
  func.func @transform_1(%arg0: i32) -> (i32, i32) {
    %c0_i32 = arith.constant 0 : i32
    %c0_i32_0 = arith.constant 0 : i32
    %c0_i32_1 = arith.constant 0 : i32
    return %c0_i32, %c0_i32_0 : i32, i32
  }
  func.func @transform_2(%arg0: i32) -> (i32, i32) {
    %c0_i32 = arith.constant 0 : i32
    %c0_i32_0 = arith.constant 0 : i32
    %c0_i32_1 = arith.constant 0 : i32
    return %c0_i32, %c0_i32_0 : i32, i32
  }
  func.func @transform_3(%arg0: i32) -> (i32, i32) {
    %c0_i32 = arith.constant 0 : i32
    %c0_i32_0 = arith.constant 0 : i32
    return %arg0, %c0_i32 : i32, i32
  }
}

</mosaic_0001>

<bundles_post_ra>
// kernel: tpu_custom_call.1
= control target key start
LH: loop header
LB: loop body
LE: loop exit
PB: predicated region body
PF: predicated region fallthrough
CT: control target
= control target key end

     0   :  { %8 = vsyncpa [#allocation3], 0  ;;  %s879_s0 = inlined_call_operand.hbm [shape: f32[16,32], index: 0, kind: input, shape index: {}]   ;;  %s880_s1 = inlined_call_operand.hbm [shape: f32[32,128], index: 1, kind: input, shape index: {}]   ;;  %s881_s2 = inlined_call_operand.vmem [shape: f32[1,128], index: 2, kind: input, shape index: {}]   ;;  %s882_s3 = inlined_call_operand.hbm [shape: f32[16,128], index: 3, kind: output, shape index: {}]  }
   0x1   :  { %9 = vsyncpa [#allocation6], 0 }
   0x2   :  { %10 = vsyncpa [#allocation4], 0  ;;  %s785_s12 = smov [#allocation2]  }
   0x3   :  { %s16_s13 = sshll.u32 %s785_s12, 4  ;;  %s17_s13 = int_to_ptr.vmem [resolvable:$true] %s16_s13 }
   0x4   :  { %s727_s14 = scalar_lea.vmem %s17_s13, 256  ;;  %p732_p1 = scmp.lt.s32.totalorder %s17_s13, %s17_s13 }
   0x5   :  { %p728_p0 = scmp.ne.s32.totalorder %s17_s13, %s727_s14  ;;  %p733_p2 = scmp.lt.s32.totalorder %s727_s14, %s727_s14 }
   0x7   :  { %p734_p3 = por %p733_p2, %p732_p1 }
   0x9   :  { %p735_p4 = pnand %p734_p3, %p728_p0 }
   0xb   :  { %738 = shalt.err (!%p735_p4)
}
   0xc   :  { %s786_s15 = smov 128   ;;  %s787_s16 = smov 8  }
   0xd   :  { %22 = dma.hbm_to_vmem [thread:$0]  %s879_s0, 256, %s17_s13, [#allocation3], %s786_s15, %s786_s15, %s787_s16  }
   0xe   :  { %s788_s19 = smov [#allocation5]  }
   0xf   :  { %s28_s20 = sshll.u32 %s788_s19, 4  ;;  %s29_s20 = int_to_ptr.vmem [resolvable:$true] %s28_s20 }
  0x10   :  { %s747_s21 = scalar_lea.vmem %s29_s20, 512  ;;  %p752_p6 = scmp.lt.s32.totalorder %s29_s20, %s29_s20 }
  0x11   :  { %p748_p5 = scmp.ne.s32.totalorder %s29_s20, %s747_s21  ;;  %p753_p7 = scmp.lt.s32.totalorder %s747_s21, %s747_s21 }
  0x13   :  { %p754_p8 = por %p753_p7, %p752_p6 }
  0x15   :  { %p755_p9 = pnand %p754_p8, %p748_p5 }
  0x17   :  { %758 = shalt.err (!%p755_p9)
}
  0x18   :  { %34 = dma.hbm_to_vmem [thread:$0]  %s880_s1, 512, %s29_s20, [#allocation6], %s786_s15, %s786_s15, %s787_s16  }
  0x19   :  { %779 = dma.done.wait [#allocation3], 256  }
  0x1a   :  { %780 = vsyncadd [#allocation3], 4294967040 }
  0x1b   :  { %781 = dma.done.wait [#allocation6], 512  }
  0x1c   :  { %782 = vsyncadd [#allocation6], 4294966784  ;;  %vm56_vm0 = vcmask 261120   ;;  %v48_v0 = vld [vmem:[#allocation5 + $0x18] sm:$0xff]  ;;  %v47_v1 = vld [vmem:[#allocation5 + $0x10] sm:$0xff] }
  0x1d   :  { %v46_v2 = vld [vmem:[#allocation5 + $0x8] sm:$0xff]  ;;  %v822_v3 = vand.u32 4294901760, %v48_v0  ;;  %v824_v4 = vand.u32 4294901760, %v47_v1  ;;  %v45_v6 = vld [vmem:[#allocation5] sm:$0xff]  ;;  %v43_v7 = vld [vmem:[#allocation2] sm:$0xff] }
  0x1e   :  { %v826_v5 = vand.u32 4294901760, %v46_v2  ;;  %v44_v8 = vld [vmem:[#allocation2 + $0x8] sm:$0xff]  ;;  %v828_v9 = vand.u32 4294901760, %v45_v6  ;;  %v58_v10 = vsel %vm56_vm0, %v43_v7, 0  ;;  %v611_v39 = vld [vmem:[%s881_s2] ss:$0 sm:$0xff] }
  0x1f   :  { %v61_v11 = vsel %vm56_vm0, %v44_v8, 0  ;;  %648 = vmatprep.subr.mxu0 %v822_v3  ;;  %v178_v12 = vsub.f32 %v48_v0, %v822_v3  ;;  %v832_v13 = vand.u32 4294901760, %v58_v10  ;;  %v185_v15 = vsub.f32 %v47_v1, %v824_v4  ;;  %s789_s2 = smov [#allocation7]  }
  0x20   :  { %v834_v14 = vand.u32 4294901760, %v61_v11  ;;  %649 = vmatpush3.msra.mxu0 %v822_v3  ;;  %v192_v16 = vsub.f32 %v46_v2, %v826_v5  ;;  %v199_v17 = vsub.f32 %v45_v6, %v828_v9  ;;  %s598_s24 = sshll.u32 %s789_s2, 4  ;;  %s599_s24 = int_to_ptr.vmem [resolvable:$true] %s598_s24 }
  0x21   :  { %650 = vmatprep.subr.mxu0 %v824_v4  ;;  %v179_v18 = vand.u32 4294901760, %v178_v12  ;;  %v133_v19 = vsub.f32 %v58_v10, %v832_v13  ;;  %v186_v20 = vand.u32 4294901760, %v185_v15  ;;  %667 = vmatprep.mubr.f32.mxu1 %v832_v13  ;;  %s759_s25 = scalar_lea.vmem %s599_s24, 256  ;;  %p764_p11 = scmp.lt.s32.totalorder %s599_s24, %s599_s24 }
  0x22   :  { %v143_v21 = vsub.f32 %v61_v11, %v834_v14  ;;  %651 = vmatpush3.msra.mxu0 %v824_v4  ;;  %v193_v22 = vand.u32 4294901760, %v192_v16  ;;  %v200_v23 = vand.u32 4294901760, %v199_v17  ;;  %p760_p10 = scmp.ne.s32.totalorder %s599_s24, %s759_s25  ;;  %p765_p12 = scmp.lt.s32.totalorder %s759_s25, %s759_s25 }
  0x23   :  { %652 = vmatprep.subr.mxu0 %v826_v5  ;;  %v180_v24 = vsub.f32 %v178_v12, %v179_v18  ;;  %v134_v25 = vand.u32 4294901760, %v133_v19  ;;  %v187_v26 = vsub.f32 %v185_v15, %v186_v20 }
  0x24   :  { %v144_v27 = vand.u32 4294901760, %v143_v21  ;;  %653 = vmatpush3.msra.mxu0 %v826_v5  ;;  %v194_v28 = vsub.f32 %v192_v16, %v193_v22  ;;  %v201_v29 = vsub.f32 %v199_v17, %v200_v23  ;;  %p766_p13 = por %p765_p12, %p764_p11 }
  0x25   :  { %654 = vmatprep.subr.mxu0 %v828_v9  ;;  %v181_v30 = vand.u32 4294901760, %v180_v24  ;;  %v135_v31 = vsub.f32 %v133_v19, %v134_v25  ;;  %v188_v32 = vand.u32 4294901760, %v187_v26 }
  0x26   :  { %v145_v33 = vsub.f32 %v143_v21, %v144_v27  ;;  %655 = vmatpush3.msra.mxu0 %v828_v9  ;;  %v195_v36 = vand.u32 4294901760, %v194_v28  ;;  %v202_v37 = vand.u32 4294901760, %v201_v29  ;;  %p767_p0 = pnand %p766_p13, %p760_p10 }
  0x27   :  { %659 = vmatprep.subr.mxu1 %v181_v30  ;;  %v136_v34 = vand.u32 4294901760, %v135_v31  ;;  %670 = vmatprep.subr.mxu0 %v178_v12 }
  0x28   :  { %v146_v35 = vand.u32 4294901760, %v145_v33  ;;  %660 = vmatpush3.msra.mxu1 %v181_v30 }
  0x29   :  { %656 = vmatprep.mubr.f32.mxu0 %v136_v34  ;;  %661 = vmatprep.subr.mxu1 %v188_v32 }
  0x2a   :  { %657 = vmatmul.mubr.f32.vlgmr.msra.gmra.mxu0 %v146_v35  ;;  %662 = vmatpush3.msra.mxu1 %v188_v32 }
  0x2b   :  { %671 = vmatpush3.msra.mxu0 %v178_v12  ;;  %663 = vmatprep.subr.mxu1 %v195_v36 }
  0x2c   :  { %672 = vmatprep.subr.mxu0 %v185_v15  ;;  %664 = vmatpush3.msra.mxu1 %v195_v36 }
  0x2d   :  { %673 = vmatpush3.msra.mxu0 %v185_v15  ;;  %665 = vmatprep.subr.mxu1 %v202_v37 }
  0x2e   :  { %674 = vmatprep.subr.mxu0 %v192_v16  ;;  %666 = vmatpush3.msra.mxu1 %v202_v37 }
  0x2f   :  { %675 = vmatpush3.msra.mxu0 %v192_v16  ;;  %668 = vmatmul.mubr.f32.vlgmr.msra.gmra.mxu1 %v834_v14 }
  0x30   :  { %676 = vmatprep.subr.mxu0 %v199_v17  ;;  %681 = vmatprep.subr.mxu1 %v822_v3 }
  0x31   :  { %677 = vmatpush3.msra.mxu0 %v199_v17  ;;  %678 = vmatprep.mubr.f32.mxu0 %v133_v19 }
  0x32   :  { %682 = vmatpush3.msra.mxu1 %v822_v3  ;;  %679 = vmatmul.mubr.f32.vlgmr.msra.gmra.mxu0 %v143_v21 }
  0x33   :  { %683 = vmatprep.subr.mxu1 %v824_v4  ;;  %692 = vmatprep.subr.mxu0 %v179_v18 }
  0x34   :  { %684 = vmatpush3.msra.mxu1 %v824_v4  ;;  %693 = vmatpush3.msra.mxu0 %v179_v18 }
  0x35   :  { %685 = vmatprep.subr.mxu1 %v826_v5  ;;  %694 = vmatprep.subr.mxu0 %v186_v20 }
  0x36   :  { %686 = vmatpush3.msra.mxu1 %v826_v5  ;;  %695 = vmatpush3.msra.mxu0 %v186_v20 }
  0x37   :  { %687 = vmatprep.subr.mxu1 %v828_v9  ;;  %696 = vmatprep.subr.mxu0 %v193_v22 }
  0x38   :  { %688 = vmatpush3.msra.mxu1 %v828_v9  ;;  %689 = vmatprep.mubr.f32.mxu1 %v134_v25 }
  0x39   :  { %697 = vmatpush3.msra.mxu0 %v193_v22  ;;  %690 = vmatmul.mubr.f32.vlgmr.msra.gmra.mxu1 %v144_v27 }
  0x3a   :  { %698 = vmatprep.subr.mxu0 %v200_v23  ;;  %703 = vmatprep.subr.mxu1 %v822_v3 }
  0x3b   :  { %699 = vmatpush3.msra.mxu0 %v200_v23  ;;  %700 = vmatprep.mubr.f32.mxu0 %v832_v13 }
  0x3c   :  { %704 = vmatpush3.msra.mxu1 %v822_v3  ;;  %701 = vmatmul.mubr.f32.vlgmr.msra.gmra.mxu0 %v834_v14 }
  0x3d   :  { %705 = vmatprep.subr.mxu1 %v824_v4  ;;  %711 = vmatprep.mubr.f32.mxu1 %v832_v13 }
  0x3e   :  { %706 = vmatpush3.msra.mxu1 %v824_v4 }
  0x3f   :  { %707 = vmatprep.subr.mxu1 %v826_v5 }
  0x40   :  { %708 = vmatpush3.msra.mxu1 %v826_v5 }
  0x41   :  { %709 = vmatprep.subr.mxu1 %v828_v9 }
  0x42   :  { %710 = vmatpush3.msra.mxu1 %v828_v9 }
  0x43   :  { %712 = vmatmul.mubr.f32.vlgmr.msra.gmra.mxu1 %v834_v14 }
  0xea   :  { %v658_v38 = vpop.f32.mrf.mxu0 }
  0xeb   :  { %v149_v42 = vadd.f32 %v658_v38, %v611_v39 }
  0xec   :  { %v138_v40 = vpop.f32.mrf.mxu0 }
  0xed   :  { %v139_v43 = vadd.f32 %v611_v39, %v138_v40 }
  0xef   :  { %v669_v41 = vpop.f32.mrf.mxu1 }
  0xf0   :  { %v246_v46 = vadd.f32 %v669_v41, %v149_v42 }
  0xf1   :  { %v239_v44 = vpop.f32.mrf.mxu1 }
  0xf2   :  { %v680_v45 = vpop.f32.mrf.mxu0  ;;  %v240_v48 = vadd.f32 %v239_v44, %v139_v43 }
  0xf3   :  { %v333_v50 = vadd.f32 %v680_v45, %v246_v46 }
  0xf4   :  { %v325_v49 = vpop.f32.mrf.mxu0 }
  0xf5   :  { %v326_v53 = vadd.f32 %v325_v49, %v240_v48 }
  0xf9   :  { %v691_v47 = vpop.f32.mrf.mxu1 }
  0xfa   :  { %v418_v54 = vadd.f32 %v691_v47, %v333_v50 }
  0xfb   :  { %v409_v51 = vpop.f32.mrf.mxu1 }
  0xfc   :  { %v702_v52 = vpop.f32.mrf.mxu0  ;;  %v410_v55 = vadd.f32 %v409_v51, %v326_v53 }
  0xfd   :  { %v507_v57 = vadd.f32 %v702_v52, %v418_v54 }
  0xfe   :  { %v500_v56 = vpop.f32.mrf.mxu0 }
  0xff   :  { %v501_v59 = vadd.f32 %v500_v56, %v410_v55 }
 0x103   :  { %v713_v58 = vpop.f32.mrf.mxu1 }
 0x104   :  { %v588_v60 = vadd.f32 %v713_v58, %v507_v57 }
 0x105   :  { %v581_v61 = vpop.f32.mrf.mxu1 }
 0x106   :  { %592 = vst [vmem:[#allocation7 + $0x8] sm:$0xff] %v588_v60  ;;  %v582_v62 = vadd.f32 %v581_v61, %v501_v59 }
 0x108   :  { %591 = vst [vmem:[#allocation7] sm:$0xff] %v582_v62 }
 0x109   :  { %770 = shalt.err (!%p767_p0)
}
 0x10a   :  { %604 = dma.vmem_to_hbm [thread:$0]  %s599_s24, 256, %s882_s3, [#allocation4], %s786_s15, %s786_s15, %s787_s16  }
 0x10b   :  { %783 = dma.done.wait [#allocation4], 256  }
 0x10c   :  { %784 = vsyncadd [#allocation4], 4294967040 }
 0x10d   :  { %608 = vsyncpa [#allocation3], 1 }
 0x10e   :  { %609 = vsyncpa [#allocation6], 1 }
 0x10f   :  { %610 = vsyncpa [#allocation4], 1 }

</bundles_post_ra>
